<compile_context>
chip_gen: v7x
topology: tpu7x:2x2x1
jax: 0.10.0
libtpu: 0.0.40
codegen_flags: <defaults>
</compile_context>

<pallas_src>
import functools

import jax
import jax.numpy as jnp
from jax.experimental import pallas as pl
from jax.experimental.pallas import tpu as pltpu


def _round_up(x, m):
    return (x + m - 1) // m * m


# --------------------------------------------------------------------------
# Conv2d(stride=1) -> per-channel affine -> ReLU
# --------------------------------------------------------------------------
def _conv_affine_relu_kernel(x_ref, w_ref, scale_ref, bias_ref, o_ref,
                             xpad_ref, col_ref, *, H, W, KH, KW, pad, dil):
    # x_ref:    (1, Cin, H*W)        flat NCHW image (bf16)
    # w_ref:    (Cout, KH*KW*Cin)    flattened conv weight (bf16)
    # scale_ref/bias_ref: (Cout, 1)  folded affine (BN and/or conv bias), f32
    # o_ref:    (1, Cout, Ho*Wo)     lane-dense, NCHW-flat output (f32)
    # xpad_ref: (Cin, pad_len)       zero-padded image, rows flattened W-major
    # col_ref:  (KH*KW*Cin, Ho*Wp)   im2col slab (Wp-strided output positions)
    Cin = x_ref.shape[1]
    Wp = W + 2 * pad
    Ho = H + 2 * pad - dil * (KH - 1)
    Wo = W + 2 * pad - dil * (KW - 1)
    LP = Ho * Wp   # output position (ho, wo) lives at flat index ho*Wp + wo

    # 1) zero-padded, row-flattened copy of this image (in-kernel padding).
    xpad_ref[...] = jnp.zeros_like(xpad_ref)
    if pad == 0:
        xpad_ref[:, :H * W] = x_ref[0]                     # single contiguous copy
    else:
        for h in range(H):
            dst = (h + pad) * Wp + pad
            xpad_ref[:, dst:dst + W] = x_ref[0, :, h * W:(h + 1) * W]

    # 2) im2col: each (kh, kw) tap is one contiguous LP-long lane slice of the
    #    padded image; stack the taps on sublanes. No value reshapes.
    for t in range(KH * KW):
        kh, kw = divmod(t, KW)
        off = dil * (kh * Wp + kw)
        col_ref[t * Cin:(t + 1) * Cin, :] = xpad_ref[:, off:off + LP]

    # 3) one MXU matmul over the full contraction (bf16 in, f32 accumulate).
    acc = jnp.dot(w_ref[...], col_ref[...],
                  preferred_element_type=jnp.float32)          # (Cout, LP)

    # 4) fused per-channel affine + ReLU epilogue in f32.
    y = jnp.maximum(acc * scale_ref[...] + bias_ref[...], 0.0).astype(o_ref.dtype)

    # 5) compact the Wp-strided rows into the lane-dense (Cout, Ho*Wo) block.
    if Wo == Wp:
        o_ref[0, :, :] = y
    else:
        for ho in range(Ho):
            o_ref[0, :, ho * Wo:(ho + 1) * Wo] = y[:, ho * Wp:ho * Wp + Wo]


def conv_affine_relu(x_nchw, w_oihw, scale, bias, *, padding, dilation=1):
    """y = relu(scale[c] * conv2d(x, w, stride=1) + bias[c]); NCHW in/out."""
    N, Cin, H, W = x_nchw.shape
    Cout, Cin_w, KH, KW = w_oihw.shape
    assert Cin == Cin_w

    Hp, Wp = H + 2 * padding, W + 2 * padding
    Ho = Hp - dilation * (KH - 1)
    Wo = Wp - dilation * (KW - 1)
    assert Ho > 0 and Wo > 0
    LP = Ho * Wp
    pad_len = _round_up(dilation * ((KH - 1) * Wp + (KW - 1)) + LP, 128)

    # Free, contiguous flatten (still NCHW); bf16 feeds the MXU.
    x_flat = x_nchw.reshape(N, Cin, H * W).astype(jnp.bfloat16)
    # Tiny weight reorder: (Cout, Cin, KH, KW) -> (Cout, KH*KW*Cin).
    w_flat = (jnp.transpose(w_oihw, (0, 2, 3, 1))
              .reshape(Cout, KH * KW * Cin).astype(jnp.bfloat16))
    scale = scale.astype(jnp.float32).reshape(Cout, 1)
    bias = bias.astype(jnp.float32).reshape(Cout, 1)

    kernel = functools.partial(_conv_affine_relu_kernel, H=H, W=W, KH=KH, KW=KW,
                               pad=padding, dil=dilation)

    out_flat = pl.pallas_call(
        kernel,
        out_shape=jax.ShapeDtypeStruct((N, Cout, Ho * Wo), jnp.float32),
        grid=(N,),
        in_specs=[
            pl.BlockSpec((1, Cin, H * W), lambda n: (n, 0, 0)),
            pl.BlockSpec((Cout, KH * KW * Cin), lambda n: (0, 0)),
            pl.BlockSpec((Cout, 1), lambda n: (0, 0)),
            pl.BlockSpec((Cout, 1), lambda n: (0, 0)),
        ],
        out_specs=pl.BlockSpec((1, Cout, Ho * Wo), lambda n: (n, 0, 0)),
        scratch_shapes=[
            pltpu.VMEM((Cin, pad_len), jnp.bfloat16),        # padded image (flat)
            pltpu.VMEM((KH * KW * Cin, LP), jnp.bfloat16),   # im2col slab
        ],
        compiler_params=pltpu.CompilerParams(
            dimension_semantics=("parallel",),
            vmem_limit_bytes=32 * 1024 * 1024,
        ),
    )(x_flat, w_flat, scale, bias)

    # Already channels-first: (N, Cout, Ho*Wo) -> (N, Cout, Ho, Wo) is free.
    return out_flat.reshape(N, Cout, Ho, Wo)


def conv_bn_relu(x_nchw, w_oihw, gamma, beta, running_mean, running_var,
                 *, padding=1, dilation=1, eps=1e-3, conv_bias=None):
    """Conv2d(stride=1) -> BatchNorm2d(eval) -> ReLU (ConvModule / SKConv branch)."""
    inv_std = jax.lax.rsqrt(running_var.astype(jnp.float32) + eps)
    scale = gamma.astype(jnp.float32) * inv_std
    bias = beta.astype(jnp.float32) - running_mean.astype(jnp.float32) * scale
    if conv_bias is not None:
        bias = bias + scale * conv_bias.astype(jnp.float32)
    return conv_affine_relu(x_nchw, w_oihw, scale, bias,
                            padding=padding, dilation=dilation)


def conv_bias_relu(x_nchw, w_oihw, conv_bias, *, padding=1, dilation=1):
    """Conv2d(stride=1, bias=True) -> ReLU (MetaConv2d path in FusionBlock)."""
    Cout = w_oihw.shape[0]
    scale = jnp.ones((Cout,), jnp.float32)
    return conv_affine_relu(x_nchw, w_oihw, scale, conv_bias.astype(jnp.float32),
                            padding=padding, dilation=dilation)


# --------------------------------------------------------------------------
# Encoder tail:  x_out = x_origin * h_sigmoid(x_act) + x_origin
# --------------------------------------------------------------------------
def _hsigmoid_blend_kernel(xo_ref, xa_ref, o_ref):
    gate = jnp.clip(xa_ref[...] + 3.0, 0.0, 6.0) * (1.0 / 6.0)   # ReLU6(x+3)/6
    o_ref[...] = xo_ref[...] * gate + xo_ref[...]


def hsigmoid_blend(x_origin, x_act):
    N, C, H, W = x_origin.shape
    xo = x_origin.reshape(N, C, H * W).astype(jnp.float32)
    xa = x_act.reshape(N, C, H * W).astype(jnp.float32)
    out = pl.pallas_call(
        _hsigmoid_blend_kernel,
        out_shape=jax.ShapeDtypeStruct((N, C, H * W), jnp.float32),
        grid=(N,),
        in_specs=[pl.BlockSpec((1, C, H * W), lambda n: (n, 0, 0)),
                  pl.BlockSpec((1, C, H * W), lambda n: (n, 0, 0))],
        out_specs=pl.BlockSpec((1, C, H * W), lambda n: (n, 0, 0)),
        compiler_params=pltpu.CompilerParams(dimension_semantics=("parallel",)),
    )(xo, xa)
    return out.reshape(N, C, H, W)


# --------------------------------------------------------------------------
# References (pure JAX) for correctness checks
# --------------------------------------------------------------------------
def _ref_conv(x, w, *, padding, dilation):
    return jax.lax.conv_general_dilated(
        x.astype(jnp.float32), w.astype(jnp.float32),
        window_strides=(1, 1),
        padding=[(padding, padding), (padding, padding)],
        rhs_dilation=(dilation, dilation),
        dimension_numbers=("NCHW", "OIHW", "NCHW"))


def _ref_conv_bn_relu(x, w, gamma, beta, rm, rv, *, padding, dilation, eps=1e-3):
    y = _ref_conv(x, w, padding=padding, dilation=dilation)
    inv_std = 1.0 / jnp.sqrt(rv + eps)
    y = (y - rm[None, :, None, None]) * (gamma * inv_std)[None, :, None, None] \
        + beta[None, :, None, None]
    return jnp.maximum(y, 0.0)


if __name__ == "__main__":
    key = jax.random.PRNGKey(0)
    ks = jax.random.split(key, 16)

    N, Cin, H, W = 2, 4, 16, 16
    Cout, KH, KW = 8, 3, 3

    x = jax.random.normal(ks[0], (N, Cin, H, W), dtype=jnp.float32)
    fan_in = Cin * KH * KW
    w = jax.random.normal(ks[1], (Cout, Cin, KH, KW), dtype=jnp.float32) / jnp.sqrt(fan_in)
    gamma = 1.0 + 0.1 * jax.random.normal(ks[2], (Cout,), dtype=jnp.float32)
    beta = 0.1 * jax.random.normal(ks[3], (Cout,), dtype=jnp.float32)
    running_mean = 0.1 * jax.random.normal(ks[4], (Cout,), dtype=jnp.float32)
    running_var = jax.random.uniform(ks[5], (Cout,), dtype=jnp.float32,
                                     minval=0.5, maxval=1.5)

    # The kernel feeds the MXU bf16 (f32 accumulation); compare against the f32
    # reference evaluated on bf16-rounded conv operands.
    x_bf = x.astype(jnp.bfloat16).astype(jnp.float32)
    w_bf = w.astype(jnp.bfloat16).astype(jnp.float32)

    # 1) SKConv branch 0: 3x3, padding=1, dilation=1 (conv->BN->ReLU).
    out = jax.block_until_ready(
        conv_bn_relu(x, w, gamma, beta, running_mean, running_var,
                     padding=1, dilation=1))
    ref = _ref_conv_bn_relu(x_bf, w_bf, gamma, beta, running_mean, running_var,
                            padding=1, dilation=1)
    assert out.shape == (N, Cout, H, W), out.shape
    assert jnp.allclose(out, ref, atol=5e-3, rtol=5e-3), \
        float(jnp.max(jnp.abs(out - ref)))

    # 2) SKConv branch 1: 3x3, padding=2, dilation=2 (same spatial size).
    out2 = jax.block_until_ready(
        conv_bn_relu(x, w, gamma, beta, running_mean, running_var,
                     padding=2, dilation=2))
    ref2 = _ref_conv_bn_relu(x_bf, w_bf, gamma, beta, running_mean, running_var,
                             padding=2, dilation=2)
    assert out2.shape == (N, Cout, H, W), out2.shape
    assert jnp.allclose(out2, ref2, atol=5e-3, rtol=5e-3), \
        float(jnp.max(jnp.abs(out2 - ref2)))

    # 3) FusionBlock MetaConv2d: 3x3, padding=1, bias=True, then ReLU (no BN).
    Cout_fb = 32
    w_fb = jax.random.normal(ks[6], (Cout_fb, Cin, KH, KW), dtype=jnp.float32) / jnp.sqrt(fan_in)
    b_fb = 0.1 * jax.random.normal(ks[7], (Cout_fb,), dtype=jnp.float32)
    out3 = jax.block_until_ready(conv_bias_relu(x, w_fb, b_fb, padding=1))
    w_fb_bf = w_fb.astype(jnp.bfloat16).astype(jnp.float32)
    ref3 = jnp.maximum(_ref_conv(x_bf, w_fb_bf, padding=1, dilation=1)
                       + b_fb[None, :, None, None], 0.0)
    assert out3.shape == (N, Cout_fb, H, W), out3.shape
    assert jnp.allclose(out3, ref3, atol=5e-3, rtol=5e-3), \
        float(jnp.max(jnp.abs(out3 - ref3)))

    # 4) Encoder's 1x1 ConvModule (conv2 / conv_module*): k=1, pad=0, conv->BN->ReLU.
    Cin1, Cout1 = 8, 8
    x1 = jax.random.normal(ks[8], (N, Cin1, H, W), dtype=jnp.float32)
    w1 = jax.random.normal(ks[9], (Cout1, Cin1, 1, 1), dtype=jnp.float32) / jnp.sqrt(Cin1)
    g1 = 1.0 + 0.1 * jax.random.normal(ks[10], (Cout1,), dtype=jnp.float32)
    bt1 = 0.1 * jax.random.normal(ks[11], (Cout1,), dtype=jnp.float32)
    rm1 = 0.1 * jax.random.normal(ks[12], (Cout1,), dtype=jnp.float32)
    rv1 = jax.random.uniform(ks[13], (Cout1,), dtype=jnp.float32, minval=0.5, maxval=1.5)
    out4 = jax.block_until_ready(
        conv_bn_relu(x1, w1, g1, bt1, rm1, rv1, padding=0, dilation=1))
    ref4 = _ref_conv_bn_relu(x1.astype(jnp.bfloat16).astype(jnp.float32),
                             w1.astype(jnp.bfloat16).astype(jnp.float32),
                             g1, bt1, rm1, rv1, padding=0, dilation=1)
    assert out4.shape == (N, Cout1, H, W), out4.shape
    assert jnp.allclose(out4, ref4, atol=5e-3, rtol=5e-3), \
        float(jnp.max(jnp.abs(out4 - ref4)))

    # 5) Final blend: x_origin * h_sigmoid(x_act) + x_origin.
    x_origin = jax.random.normal(ks[14], (N, Cout1, H, W), dtype=jnp.float32)
    x_act = jax.random.normal(ks[15], (N, Cout1, H, W), dtype=jnp.float32)
    out5 = jax.block_until_ready(hsigmoid_blend(x_origin, x_act))
    gate = jnp.clip(x_act + 3.0, 0.0, 6.0) / 6.0
    ref5 = x_origin * gate + x_origin
    assert out5.shape == (N, Cout1, H, W), out5.shape
    assert jnp.allclose(out5, ref5, atol=1e-5, rtol=1e-5), \
        float(jnp.max(jnp.abs(out5 - ref5)))

    print("KERNEL_OK")
</pallas_src>

<mosaic_0001>
module attributes {stable_mosaic.version = 11 : i64} {
  func.func @_conv_affine_relu_kernel(%arg0: i32, %arg1: memref<1x4x256xbf16, #tpu.memory_space<vmem>>, %arg2: memref<8x36xbf16, #tpu.memory_space<vmem>>, %arg3: memref<8x1xf32, #tpu.memory_space<vmem>>, %arg4: memref<8x1xf32, #tpu.memory_space<vmem>>, %arg5: memref<1x8x256xf32, #tpu.memory_space<vmem>>, %arg6: memref<4x384xbf16, #tpu.memory_space<vmem>>, %arg7: memref<36x288xbf16, #tpu.memory_space<vmem>>) attributes {dimension_semantics = [#tpu.dimension_semantics<parallel>], iteration_bounds = array<i64: 2>, scalar_prefetch = 0 : i64, scratch_operands = 2 : i64, tpu.core_type = #tpu.core_type<tc>, window_params = [{transform_indices = @transform_0, window_bounds = array<i64: 1, 4, 256>}, {pipeline_mode = #tpu.pipeline_mode<synchronous>, transform_indices = @transform_1, window_bounds = array<i64: 8, 36>}, {pipeline_mode = #tpu.pipeline_mode<synchronous>, transform_indices = @transform_2, window_bounds = array<i64: 8, 1>}, {pipeline_mode = #tpu.pipeline_mode<synchronous>, transform_indices = @transform_3, window_bounds = array<i64: 8, 1>}, {transform_indices = @transform_4, window_bounds = array<i64: 1, 8, 256>}]} {
    %cst = arith.constant 0.000000e+00 : bf16
    %0 = vector.broadcast %cst : bf16 to vector<4x384xbf16>
    %c0 = arith.constant 0 : index
    %c0_0 = arith.constant 0 : index
    %1 = vector.load %arg6[%c0, %c0_0] : memref<4x384xbf16, #tpu.memory_space<vmem>>, vector<4x384xbf16>
    tpu.vector_store %arg6[%c0, %c0_0], %0 {strides = array<i32>} : memref<4x384xbf16, #tpu.memory_space<vmem>>, vector<4x384xbf16>,
    %c0_1 = arith.constant 0 : index
    %c0_2 = arith.constant 0 : index
    %c0_3 = arith.constant 0 : index
    %2 = vector.load %arg1[%c0_1, %c0_2, %c0_3] : memref<1x4x256xbf16, #tpu.memory_space<vmem>>, vector<1x4x16xbf16>
    %3 = vector.shape_cast %2 : vector<1x4x16xbf16> to vector<4x16xbf16>
    %c0_4 = arith.constant 0 : index
    %c19 = arith.constant 19 : index
    %4 = vector.load %arg6[%c0_4, %c19] : memref<4x384xbf16, #tpu.memory_space<vmem>>, vector<4x16xbf16>
    tpu.vector_store %arg6[%c0_4, %c19], %3 {strides = array<i32>} : memref<4x384xbf16, #tpu.memory_space<vmem>>, vector<4x16xbf16>,
    %c0_5 = arith.constant 0 : index
    %c0_6 = arith.constant 0 : index
    %c16 = arith.constant 16 : index
    %5 = vector.load %arg1[%c0_5, %c0_6, %c16] : memref<1x4x256xbf16, #tpu.memory_space<vmem>>, vector<1x4x16xbf16>
    %6 = vector.shape_cast %5 : vector<1x4x16xbf16> to vector<4x16xbf16>
    %c0_7 = arith.constant 0 : index
    %c37 = arith.constant 37 : index
    %7 = vector.load %arg6[%c0_7, %c37] : memref<4x384xbf16, #tpu.memory_space<vmem>>, vector<4x16xbf16>
    tpu.vector_store %arg6[%c0_7, %c37], %6 {strides = array<i32>} : memref<4x384xbf16, #tpu.memory_space<vmem>>, vector<4x16xbf16>,
    %c0_8 = arith.constant 0 : index
    %c0_9 = arith.constant 0 : index
    %c32 = arith.constant 32 : index
    %8 = vector.load %arg1[%c0_8, %c0_9, %c32] : memref<1x4x256xbf16, #tpu.memory_space<vmem>>, vector<1x4x16xbf16>
    %9 = vector.shape_cast %8 : vector<1x4x16xbf16> to vector<4x16xbf16>
    %c0_10 = arith.constant 0 : index
    %c55 = arith.constant 55 : index
    %10 = vector.load %arg6[%c0_10, %c55] : memref<4x384xbf16, #tpu.memory_space<vmem>>, vector<4x16xbf16>
    tpu.vector_store %arg6[%c0_10, %c55], %9 {strides = array<i32>} : memref<4x384xbf16, #tpu.memory_space<vmem>>, vector<4x16xbf16>,
    %c0_11 = arith.constant 0 : index
    %c0_12 = arith.constant 0 : index
    %c48 = arith.constant 48 : index
    %11 = vector.load %arg1[%c0_11, %c0_12, %c48] : memref<1x4x256xbf16, #tpu.memory_space<vmem>>, vector<1x4x16xbf16>
    %12 = vector.shape_cast %11 : vector<1x4x16xbf16> to vector<4x16xbf16>
    %c0_13 = arith.constant 0 : index
    %c73 = arith.constant 73 : index
    %13 = vector.load %arg6[%c0_13, %c73] : memref<4x384xbf16, #tpu.memory_space<vmem>>, vector<4x16xbf16>
    tpu.vector_store %arg6[%c0_13, %c73], %12 {strides = array<i32>} : memref<4x384xbf16, #tpu.memory_space<vmem>>, vector<4x16xbf16>,
    %c0_14 = arith.constant 0 : index
    %c0_15 = arith.constant 0 : index
    %c64 = arith.constant 64 : index
    %14 = vector.load %arg1[%c0_14, %c0_15, %c64] : memref<1x4x256xbf16, #tpu.memory_space<vmem>>, vector<1x4x16xbf16>
    %15 = vector.shape_cast %14 : vector<1x4x16xbf16> to vector<4x16xbf16>
    %c0_16 = arith.constant 0 : index
    %c91 = arith.constant 91 : index
    %16 = vector.load %arg6[%c0_16, %c91] : memref<4x384xbf16, #tpu.memory_space<vmem>>, vector<4x16xbf16>
    tpu.vector_store %arg6[%c0_16, %c91], %15 {strides = array<i32>} : memref<4x384xbf16, #tpu.memory_space<vmem>>, vector<4x16xbf16>,
    %c0_17 = arith.constant 0 : index
    %c0_18 = arith.constant 0 : index
    %c80 = arith.constant 80 : index
    %17 = vector.load %arg1[%c0_17, %c0_18, %c80] : memref<1x4x256xbf16, #tpu.memory_space<vmem>>, vector<1x4x16xbf16>
    %18 = vector.shape_cast %17 : vector<1x4x16xbf16> to vector<4x16xbf16>
    %c0_19 = arith.constant 0 : index
    %c109 = arith.constant 109 : index
    %19 = vector.load %arg6[%c0_19, %c109] : memref<4x384xbf16, #tpu.memory_space<vmem>>, vector<4x16xbf16>
    tpu.vector_store %arg6[%c0_19, %c109], %18 {strides = array<i32>} : memref<4x384xbf16, #tpu.memory_space<vmem>>, vector<4x16xbf16>,
    %c0_20 = arith.constant 0 : index
    %c0_21 = arith.constant 0 : index
    %c96 = arith.constant 96 : index
    %20 = vector.load %arg1[%c0_20, %c0_21, %c96] : memref<1x4x256xbf16, #tpu.memory_space<vmem>>, vector<1x4x16xbf16>
    %21 = vector.shape_cast %20 : vector<1x4x16xbf16> to vector<4x16xbf16>
    %c0_22 = arith.constant 0 : index
    %c127 = arith.constant 127 : index
    %22 = vector.load %arg6[%c0_22, %c127] : memref<4x384xbf16, #tpu.memory_space<vmem>>, vector<4x16xbf16>
    tpu.vector_store %arg6[%c0_22, %c127], %21 {strides = array<i32>} : memref<4x384xbf16, #tpu.memory_space<vmem>>, vector<4x16xbf16>,
    %c0_23 = arith.constant 0 : index
    %c0_24 = arith.constant 0 : index
    %c112 = arith.constant 112 : index
    %23 = vector.load %arg1[%c0_23, %c0_24, %c112] : memref<1x4x256xbf16, #tpu.memory_space<vmem>>, vector<1x4x16xbf16>
    %24 = vector.shape_cast %23 : vector<1x4x16xbf16> to vector<4x16xbf16>
    %c0_25 = arith.constant 0 : index
    %c145 = arith.constant 145 : index
    %25 = vector.load %arg6[%c0_25, %c145] : memref<4x384xbf16, #tpu.memory_space<vmem>>, vector<4x16xbf16>
    tpu.vector_store %arg6[%c0_25, %c145], %24 {strides = array<i32>} : memref<4x384xbf16, #tpu.memory_space<vmem>>, vector<4x16xbf16>,
    %c0_26 = arith.constant 0 : index
    %c0_27 = arith.constant 0 : index
    %c128 = arith.constant 128 : index
    %26 = vector.load %arg1[%c0_26, %c0_27, %c128] : memref<1x4x256xbf16, #tpu.memory_space<vmem>>, vector<1x4x16xbf16>
    %27 = vector.shape_cast %26 : vector<1x4x16xbf16> to vector<4x16xbf16>
    %c0_28 = arith.constant 0 : index
    %c163 = arith.constant 163 : index
    %28 = vector.load %arg6[%c0_28, %c163] : memref<4x384xbf16, #tpu.memory_space<vmem>>, vector<4x16xbf16>
    tpu.vector_store %arg6[%c0_28, %c163], %27 {strides = array<i32>} : memref<4x384xbf16, #tpu.memory_space<vmem>>, vector<4x16xbf16>,
    %c0_29 = arith.constant 0 : index
    %c0_30 = arith.constant 0 : index
    %c144 = arith.constant 144 : index
    %29 = vector.load %arg1[%c0_29, %c0_30, %c144] : memref<1x4x256xbf16, #tpu.memory_space<vmem>>, vector<1x4x16xbf16>
    %30 = vector.shape_cast %29 : vector<1x4x16xbf16> to vector<4x16xbf16>
    %c0_31 = arith.constant 0 : index
    %c181 = arith.constant 181 : index
    %31 = vector.load %arg6[%c0_31, %c181] : memref<4x384xbf16, #tpu.memory_space<vmem>>, vector<4x16xbf16>
    tpu.vector_store %arg6[%c0_31, %c181], %30 {strides = array<i32>} : memref<4x384xbf16, #tpu.memory_space<vmem>>, vector<4x16xbf16>,
    %c0_32 = arith.constant 0 : index
    %c0_33 = arith.constant 0 : index
    %c160 = arith.constant 160 : index
    %32 = vector.load %arg1[%c0_32, %c0_33, %c160] : memref<1x4x256xbf16, #tpu.memory_space<vmem>>, vector<1x4x16xbf16>
    %33 = vector.shape_cast %32 : vector<1x4x16xbf16> to vector<4x16xbf16>
    %c0_34 = arith.constant 0 : index
    %c199 = arith.constant 199 : index
    %34 = vector.load %arg6[%c0_34, %c199] : memref<4x384xbf16, #tpu.memory_space<vmem>>, vector<4x16xbf16>
    tpu.vector_store %arg6[%c0_34, %c199], %33 {strides = array<i32>} : memref<4x384xbf16, #tpu.memory_space<vmem>>, vector<4x16xbf16>,
    %c0_35 = arith.constant 0 : index
    %c0_36 = arith.constant 0 : index
    %c176 = arith.constant 176 : index
    %35 = vector.load %arg1[%c0_35, %c0_36, %c176] : memref<1x4x256xbf16, #tpu.memory_space<vmem>>, vector<1x4x16xbf16>
    %36 = vector.shape_cast %35 : vector<1x4x16xbf16> to vector<4x16xbf16>
    %c0_37 = arith.constant 0 : index
    %c217 = arith.constant 217 : index
    %37 = vector.load %arg6[%c0_37, %c217] : memref<4x384xbf16, #tpu.memory_space<vmem>>, vector<4x16xbf16>
    tpu.vector_store %arg6[%c0_37, %c217], %36 {strides = array<i32>} : memref<4x384xbf16, #tpu.memory_space<vmem>>, vector<4x16xbf16>,
    %c0_38 = arith.constant 0 : index
    %c0_39 = arith.constant 0 : index
    %c192 = arith.constant 192 : index
    %38 = vector.load %arg1[%c0_38, %c0_39, %c192] : memref<1x4x256xbf16, #tpu.memory_space<vmem>>, vector<1x4x16xbf16>
    %39 = vector.shape_cast %38 : vector<1x4x16xbf16> to vector<4x16xbf16>
    %c0_40 = arith.constant 0 : index
    %c235 = arith.constant 235 : index
    %40 = vector.load %arg6[%c0_40, %c235] : memref<4x384xbf16, #tpu.memory_space<vmem>>, vector<4x16xbf16>
    tpu.vector_store %arg6[%c0_40, %c235], %39 {strides = array<i32>} : memref<4x384xbf16, #tpu.memory_space<vmem>>, vector<4x16xbf16>,
    %c0_41 = arith.constant 0 : index
    %c0_42 = arith.constant 0 : index
    %c208 = arith.constant 208 : index
    %41 = vector.load %arg1[%c0_41, %c0_42, %c208] : memref<1x4x256xbf16, #tpu.memory_space<vmem>>, vector<1x4x16xbf16>
    %42 = vector.shape_cast %41 : vector<1x4x16xbf16> to vector<4x16xbf16>
    %c0_43 = arith.constant 0 : index
    %c253 = arith.constant 253 : index
    %43 = vector.load %arg6[%c0_43, %c253] : memref<4x384xbf16, #tpu.memory_space<vmem>>, vector<4x16xbf16>
    tpu.vector_store %arg6[%c0_43, %c253], %42 {strides = array<i32>} : memref<4x384xbf16, #tpu.memory_space<vmem>>, vector<4x16xbf16>,
    %c0_44 = arith.constant 0 : index
    %c0_45 = arith.constant 0 : index
    %c224 = arith.constant 224 : index
    %44 = vector.load %arg1[%c0_44, %c0_45, %c224] : memref<1x4x256xbf16, #tpu.memory_space<vmem>>, vector<1x4x16xbf16>
    %45 = vector.shape_cast %44 : vector<1x4x16xbf16> to vector<4x16xbf16>
    %c0_46 = arith.constant 0 : index
    %c271 = arith.constant 271 : index
    %46 = vector.load %arg6[%c0_46, %c271] : memref<4x384xbf16, #tpu.memory_space<vmem>>, vector<4x16xbf16>
    tpu.vector_store %arg6[%c0_46, %c271], %45 {strides = array<i32>} : memref<4x384xbf16, #tpu.memory_space<vmem>>, vector<4x16xbf16>,
    %c0_47 = arith.constant 0 : index
    %c0_48 = arith.constant 0 : index
    %c240 = arith.constant 240 : index
    %47 = vector.load %arg1[%c0_47, %c0_48, %c240] : memref<1x4x256xbf16, #tpu.memory_space<vmem>>, vector<1x4x16xbf16>
    %48 = vector.shape_cast %47 : vector<1x4x16xbf16> to vector<4x16xbf16>
    %c0_49 = arith.constant 0 : index
    %c289 = arith.constant 289 : index
    %49 = vector.load %arg6[%c0_49, %c289] : memref<4x384xbf16, #tpu.memory_space<vmem>>, vector<4x16xbf16>
    tpu.vector_store %arg6[%c0_49, %c289], %48 {strides = array<i32>} : memref<4x384xbf16, #tpu.memory_space<vmem>>, vector<4x16xbf16>,
    %c0_50 = arith.constant 0 : index
    %c0_51 = arith.constant 0 : index
    %50 = vector.load %arg6[%c0_50, %c0_51] : memref<4x384xbf16, #tpu.memory_space<vmem>>, vector<4x288xbf16>
    %c0_52 = arith.constant 0 : index
    %c0_53 = arith.constant 0 : index
    %51 = vector.load %arg7[%c0_52, %c0_53] : memref<36x288xbf16, #tpu.memory_space<vmem>>, vector<4x288xbf16>
    tpu.vector_store %arg7[%c0_52, %c0_53], %50 {strides = array<i32>} : memref<36x288xbf16, #tpu.memory_space<vmem>>, vector<4x288xbf16>,
    %c0_54 = arith.constant 0 : index
    %c1 = arith.constant 1 : index
    %52 = vector.load %arg6[%c0_54, %c1] : memref<4x384xbf16, #tpu.memory_space<vmem>>, vector<4x288xbf16>
    %c4 = arith.constant 4 : index
    %c0_55 = arith.constant 0 : index
    %53 = vector.load %arg7[%c4, %c0_55] : memref<36x288xbf16, #tpu.memory_space<vmem>>, vector<4x288xbf16>
    tpu.vector_store %arg7[%c4, %c0_55], %52 {strides = array<i32>} : memref<36x288xbf16, #tpu.memory_space<vmem>>, vector<4x288xbf16>,
    %c0_56 = arith.constant 0 : index
    %c2 = arith.constant 2 : index
    %54 = vector.load %arg6[%c0_56, %c2] : memref<4x384xbf16, #tpu.memory_space<vmem>>, vector<4x288xbf16>
    %c8 = arith.constant 8 : index
    %c0_57 = arith.constant 0 : index
    %55 = vector.load %arg7[%c8, %c0_57] : memref<36x288xbf16, #tpu.memory_space<vmem>>, vector<4x288xbf16>
    tpu.vector_store %arg7[%c8, %c0_57], %54 {strides = array<i32>} : memref<36x288xbf16, #tpu.memory_space<vmem>>, vector<4x288xbf16>,
    %c0_58 = arith.constant 0 : index
    %c18 = arith.constant 18 : index
    %56 = vector.load %arg6[%c0_58, %c18] : memref<4x384xbf16, #tpu.memory_space<vmem>>, vector<4x288xbf16>
    %c12 = arith.constant 12 : index
    %c0_59 = arith.constant 0 : index
    %57 = vector.load %arg7[%c12, %c0_59] : memref<36x288xbf16, #tpu.memory_space<vmem>>, vector<4x288xbf16>
    tpu.vector_store %arg7[%c12, %c0_59], %56 {strides = array<i32>} : memref<36x288xbf16, #tpu.memory_space<vmem>>, vector<4x288xbf16>,
    %c0_60 = arith.constant 0 : index
    %c19_61 = arith.constant 19 : index
    %58 = vector.load %arg6[%c0_60, %c19_61] : memref<4x384xbf16, #tpu.memory_space<vmem>>, vector<4x288xbf16>
    %c16_62 = arith.constant 16 : index
    %c0_63 = arith.constant 0 : index
    %59 = vector.load %arg7[%c16_62, %c0_63] : memref<36x288xbf16, #tpu.memory_space<vmem>>, vector<4x288xbf16>
    tpu.vector_store %arg7[%c16_62, %c0_63], %58 {strides = array<i32>} : memref<36x288xbf16, #tpu.memory_space<vmem>>, vector<4x288xbf16>,
    %c0_64 = arith.constant 0 : index
    %c20 = arith.constant 20 : index
    %60 = vector.load %arg6[%c0_64, %c20] : memref<4x384xbf16, #tpu.memory_space<vmem>>, vector<4x288xbf16>
    %c20_65 = arith.constant 20 : index
    %c0_66 = arith.constant 0 : index
    %61 = vector.load %arg7[%c20_65, %c0_66] : memref<36x288xbf16, #tpu.memory_space<vmem>>, vector<4x288xbf16>
    tpu.vector_store %arg7[%c20_65, %c0_66], %60 {strides = array<i32>} : memref<36x288xbf16, #tpu.memory_space<vmem>>, vector<4x288xbf16>,
    %c0_67 = arith.constant 0 : index
    %c36 = arith.constant 36 : index
    %62 = vector.load %arg6[%c0_67, %c36] : memref<4x384xbf16, #tpu.memory_space<vmem>>, vector<4x288xbf16>
    %c24 = arith.constant 24 : index
    %c0_68 = arith.constant 0 : index
    %63 = vector.load %arg7[%c24, %c0_68] : memref<36x288xbf16, #tpu.memory_space<vmem>>, vector<4x288xbf16>
    tpu.vector_store %arg7[%c24, %c0_68], %62 {strides = array<i32>} : memref<36x288xbf16, #tpu.memory_space<vmem>>, vector<4x288xbf16>,
    %c0_69 = arith.constant 0 : index
    %c37_70 = arith.constant 37 : index
    %64 = vector.load %arg6[%c0_69, %c37_70] : memref<4x384xbf16, #tpu.memory_space<vmem>>, vector<4x288xbf16>
    %c28 = arith.constant 28 : index
    %c0_71 = arith.constant 0 : index
    %65 = vector.load %arg7[%c28, %c0_71] : memref<36x288xbf16, #tpu.memory_space<vmem>>, vector<4x288xbf16>
    tpu.vector_store %arg7[%c28, %c0_71], %64 {strides = array<i32>} : memref<36x288xbf16, #tpu.memory_space<vmem>>, vector<4x288xbf16>,
    %c0_72 = arith.constant 0 : index
    %c38 = arith.constant 38 : index
    %66 = vector.load %arg6[%c0_72, %c38] : memref<4x384xbf16, #tpu.memory_space<vmem>>, vector<4x288xbf16>
    %c32_73 = arith.constant 32 : index
    %c0_74 = arith.constant 0 : index
    %67 = vector.load %arg7[%c32_73, %c0_74] : memref<36x288xbf16, #tpu.memory_space<vmem>>, vector<4x288xbf16>
    tpu.vector_store %arg7[%c32_73, %c0_74], %66 {strides = array<i32>} : memref<36x288xbf16, #tpu.memory_space<vmem>>, vector<4x288xbf16>,
    %c0_75 = arith.constant 0 : index
    %c0_76 = arith.constant 0 : index
    %68 = vector.load %arg2[%c0_75, %c0_76] : memref<8x36xbf16, #tpu.memory_space<vmem>>, vector<8x36xbf16>
    %c0_77 = arith.constant 0 : index
    %c0_78 = arith.constant 0 : index
    %69 = vector.load %arg7[%c0_77, %c0_78] : memref<36x288xbf16, #tpu.memory_space<vmem>>, vector<36x288xbf16>
    %cst_79 = arith.constant dense<0.000000e+00> : vector<8x288xf32>
    %70 = tpu.matmul %68, %69, %cst_79 {dimension_numbers = #tpu.dot_dimension_numbers<[1], [0], [0], [1], [0, 0, 1, 1], [], []>} : vector<8x36xbf16>, vector<36x288xbf16>, vector<8x288xf32> -> vector<8x288xf32>
    %c0_80 = arith.constant 0 : index
    %c0_81 = arith.constant 0 : index
    %71 = vector.load %arg3[%c0_80, %c0_81] : memref<8x1xf32, #tpu.memory_space<vmem>>, vector<8x1xf32>
    %72 = vector.broadcast %71 : vector<8x1xf32> to vector<8x288xf32>
    %73 = arith.mulf %70, %72 : vector<8x288xf32>
    %c0_82 = arith.constant 0 : index
    %c0_83 = arith.constant 0 : index
    %74 = vector.load %arg4[%c0_82, %c0_83] : memref<8x1xf32, #tpu.memory_space<vmem>>, vector<8x1xf32>
    %75 = vector.broadcast %74 : vector<8x1xf32> to vector<8x288xf32>
    %76 = arith.addf %73, %75 : vector<8x288xf32>
    %cst_84 = arith.constant 0.000000e+00 : f32
    %77 = vector.broadcast %cst_84 : f32 to vector<8x288xf32>
    %78 = arith.maximumf %76, %77 : vector<8x288xf32>
    %79 = vector.extract_strided_slice %78 {offsets = [0, 0], sizes = [8, 16], strides = [1, 1]} : vector<8x288xf32> to vector<8x16xf32>
    %c0_85 = arith.constant 0 : index
    %c0_86 = arith.constant 0 : index
    %c0_87 = arith.constant 0 : index
    %80 = vector.load %arg5[%c0_85, %c0_86, %c0_87] : memref<1x8x256xf32, #tpu.memory_space<vmem>>, vector<1x8x16xf32>
    %81 = vector.shape_cast %80 : vector<1x8x16xf32> to vector<8x16xf32>
    %82 = vector.shape_cast %79 : vector<8x16xf32> to vector<1x8x16xf32>
    tpu.vector_store %arg5[%c0_85, %c0_86, %c0_87], %82 {strides = array<i32>} : memref<1x8x256xf32, #tpu.memory_space<vmem>>, vector<1x8x16xf32>,
    %83 = vector.extract_strided_slice %78 {offsets = [0, 18], sizes = [8, 16], strides = [1, 1]} : vector<8x288xf32> to vector<8x16xf32>
    %c0_88 = arith.constant 0 : index
    %c0_89 = arith.constant 0 : index
    %c16_90 = arith.constant 16 : index
    %84 = vector.load %arg5[%c0_88, %c0_89, %c16_90] : memref<1x8x256xf32, #tpu.memory_space<vmem>>, vector<1x8x16xf32>
    %85 = vector.shape_cast %84 : vector<1x8x16xf32> to vector<8x16xf32>
    %86 = vector.shape_cast %83 : vector<8x16xf32> to vector<1x8x16xf32>
    tpu.vector_store %arg5[%c0_88, %c0_89, %c16_90], %86 {strides = array<i32>} : memref<1x8x256xf32, #tpu.memory_space<vmem>>, vector<1x8x16xf32>,
    %87 = vector.extract_strided_slice %78 {offsets = [0, 36], sizes = [8, 16], strides = [1, 1]} : vector<8x288xf32> to vector<8x16xf32>
    %c0_91 = arith.constant 0 : index
    %c0_92 = arith.constant 0 : index
    %c32_93 = arith.constant 32 : index
    %88 = vector.load %arg5[%c0_91, %c0_92, %c32_93] : memref<1x8x256xf32, #tpu.memory_space<vmem>>, vector<1x8x16xf32>
    %89 = vector.shape_cast %88 : vector<1x8x16xf32> to vector<8x16xf32>
    %90 = vector.shape_cast %87 : vector<8x16xf32> to vector<1x8x16xf32>
    tpu.vector_store %arg5[%c0_91, %c0_92, %c32_93], %90 {strides = array<i32>} : memref<1x8x256xf32, #tpu.memory_space<vmem>>, vector<1x8x16xf32>,
    %91 = vector.extract_strided_slice %78 {offsets = [0, 54], sizes = [8, 16], strides = [1, 1]} : vector<8x288xf32> to vector<8x16xf32>
    %c0_94 = arith.constant 0 : index
    %c0_95 = arith.constant 0 : index
    %c48_96 = arith.constant 48 : index
    %92 = vector.load %arg5[%c0_94, %c0_95, %c48_96] : memref<1x8x256xf32, #tpu.memory_space<vmem>>, vector<1x8x16xf32>
    %93 = vector.shape_cast %92 : vector<1x8x16xf32> to vector<8x16xf32>
    %94 = vector.shape_cast %91 : vector<8x16xf32> to vector<1x8x16xf32>
    tpu.vector_store %arg5[%c0_94, %c0_95, %c48_96], %94 {strides = array<i32>} : memref<1x8x256xf32, #tpu.memory_space<vmem>>, vector<1x8x16xf32>,
    %95 = vector.extract_strided_slice %78 {offsets = [0, 72], sizes = [8, 16], strides = [1, 1]} : vector<8x288xf32> to vector<8x16xf32>
    %c0_97 = arith.constant 0 : index
    %c0_98 = arith.constant 0 : index
    %c64_99 = arith.constant 64 : index
    %96 = vector.load %arg5[%c0_97, %c0_98, %c64_99] : memref<1x8x256xf32, #tpu.memory_space<vmem>>, vector<1x8x16xf32>
    %97 = vector.shape_cast %96 : vector<1x8x16xf32> to vector<8x16xf32>
    %98 = vector.shape_cast %95 : vector<8x16xf32> to vector<1x8x16xf32>
    tpu.vector_store %arg5[%c0_97, %c0_98, %c64_99], %98 {strides = array<i32>} : memref<1x8x256xf32, #tpu.memory_space<vmem>>, vector<1x8x16xf32>,
    %99 = vector.extract_strided_slice %78 {offsets = [0, 90], sizes = [8, 16], strides = [1, 1]} : vector<8x288xf32> to vector<8x16xf32>
    %c0_100 = arith.constant 0 : index
    %c0_101 = arith.constant 0 : index
    %c80_102 = arith.constant 80 : index
    %100 = vector.load %arg5[%c0_100, %c0_101, %c80_102] : memref<1x8x256xf32, #tpu.memory_space<vmem>>, vector<1x8x16xf32>
    %101 = vector.shape_cast %100 : vector<1x8x16xf32> to vector<8x16xf32>
    %102 = vector.shape_cast %99 : vector<8x16xf32> to vector<1x8x16xf32>
    tpu.vector_store %arg5[%c0_100, %c0_101, %c80_102], %102 {strides = array<i32>} : memref<1x8x256xf32, #tpu.memory_space<vmem>>, vector<1x8x16xf32>,
    %103 = vector.extract_strided_slice %78 {offsets = [0, 108], sizes = [8, 16], strides = [1, 1]} : vector<8x288xf32> to vector<8x16xf32>
    %c0_103 = arith.constant 0 : index
    %c0_104 = arith.constant 0 : index
    %c96_105 = arith.constant 96 : index
    %104 = vector.load %arg5[%c0_103, %c0_104, %c96_105] : memref<1x8x256xf32, #tpu.memory_space<vmem>>, vector<1x8x16xf32>
    %105 = vector.shape_cast %104 : vector<1x8x16xf32> to vector<8x16xf32>
    %106 = vector.shape_cast %103 : vector<8x16xf32> to vector<1x8x16xf32>
    tpu.vector_store %arg5[%c0_103, %c0_104, %c96_105], %106 {strides = array<i32>} : memref<1x8x256xf32, #tpu.memory_space<vmem>>, vector<1x8x16xf32>,
    %107 = vector.extract_strided_slice %78 {offsets = [0, 126], sizes = [8, 16], strides = [1, 1]} : vector<8x288xf32> to vector<8x16xf32>
    %c0_106 = arith.constant 0 : index
    %c0_107 = arith.constant 0 : index
    %c112_108 = arith.constant 112 : index
    %108 = vector.load %arg5[%c0_106, %c0_107, %c112_108] : memref<1x8x256xf32, #tpu.memory_space<vmem>>, vector<1x8x16xf32>
    %109 = vector.shape_cast %108 : vector<1x8x16xf32> to vector<8x16xf32>
    %110 = vector.shape_cast %107 : vector<8x16xf32> to vector<1x8x16xf32>
    tpu.vector_store %arg5[%c0_106, %c0_107, %c112_108], %110 {strides = array<i32>} : memref<1x8x256xf32, #tpu.memory_space<vmem>>, vector<1x8x16xf32>,
    %111 = vector.extract_strided_slice %78 {offsets = [0, 144], sizes = [8, 16], strides = [1, 1]} : vector<8x288xf32> to vector<8x16xf32>
    %c0_109 = arith.constant 0 : index
    %c0_110 = arith.constant 0 : index
    %c128_111 = arith.constant 128 : index
    %112 = vector.load %arg5[%c0_109, %c0_110, %c128_111] : memref<1x8x256xf32, #tpu.memory_space<vmem>>, vector<1x8x16xf32>
    %113 = vector.shape_cast %112 : vector<1x8x16xf32> to vector<8x16xf32>
    %114 = vector.shape_cast %111 : vector<8x16xf32> to vector<1x8x16xf32>
    tpu.vector_store %arg5[%c0_109, %c0_110, %c128_111], %114 {strides = array<i32>} : memref<1x8x256xf32, #tpu.memory_space<vmem>>, vector<1x8x16xf32>,
    %115 = vector.extract_strided_slice %78 {offsets = [0, 162], sizes = [8, 16], strides = [1, 1]} : vector<8x288xf32> to vector<8x16xf32>
    %c0_112 = arith.constant 0 : index
    %c0_113 = arith.constant 0 : index
    %c144_114 = arith.constant 144 : index
    %116 = vector.load %arg5[%c0_112, %c0_113, %c144_114] : memref<1x8x256xf32, #tpu.memory_space<vmem>>, vector<1x8x16xf32>
    %117 = vector.shape_cast %116 : vector<1x8x16xf32> to vector<8x16xf32>
    %118 = vector.shape_cast %115 : vector<8x16xf32> to vector<1x8x16xf32>
    tpu.vector_store %arg5[%c0_112, %c0_113, %c144_114], %118 {strides = array<i32>} : memref<1x8x256xf32, #tpu.memory_space<vmem>>, vector<1x8x16xf32>,
    %119 = vector.extract_strided_slice %78 {offsets = [0, 180], sizes = [8, 16], strides = [1, 1]} : vector<8x288xf32> to vector<8x16xf32>
    %c0_115 = arith.constant 0 : index
    %c0_116 = arith.constant 0 : index
    %c160_117 = arith.constant 160 : index
    %120 = vector.load %arg5[%c0_115, %c0_116, %c160_117] : memref<1x8x256xf32, #tpu.memory_space<vmem>>, vector<1x8x16xf32>
    %121 = vector.shape_cast %120 : vector<1x8x16xf32> to vector<8x16xf32>
    %122 = vector.shape_cast %119 : vector<8x16xf32> to vector<1x8x16xf32>
    tpu.vector_store %arg5[%c0_115, %c0_116, %c160_117], %122 {strides = array<i32>} : memref<1x8x256xf32, #tpu.memory_space<vmem>>, vector<1x8x16xf32>,
    %123 = vector.extract_strided_slice %78 {offsets = [0, 198], sizes = [8, 16], strides = [1, 1]} : vector<8x288xf32> to vector<8x16xf32>
    %c0_118 = arith.constant 0 : index
    %c0_119 = arith.constant 0 : index
    %c176_120 = arith.constant 176 : index
    %124 = vector.load %arg5[%c0_118, %c0_119, %c176_120] : memref<1x8x256xf32, #tpu.memory_space<vmem>>, vector<1x8x16xf32>
    %125 = vector.shape_cast %124 : vector<1x8x16xf32> to vector<8x16xf32>
    %126 = vector.shape_cast %123 : vector<8x16xf32> to vector<1x8x16xf32>
    tpu.vector_store %arg5[%c0_118, %c0_119, %c176_120], %126 {strides = array<i32>} : memref<1x8x256xf32, #tpu.memory_space<vmem>>, vector<1x8x16xf32>,
    %127 = vector.extract_strided_slice %78 {offsets = [0, 216], sizes = [8, 16], strides = [1, 1]} : vector<8x288xf32> to vector<8x16xf32>
    %c0_121 = arith.constant 0 : index
    %c0_122 = arith.constant 0 : index
    %c192_123 = arith.constant 192 : index
    %128 = vector.load %arg5[%c0_121, %c0_122, %c192_123] : memref<1x8x256xf32, #tpu.memory_space<vmem>>, vector<1x8x16xf32>
    %129 = vector.shape_cast %128 : vector<1x8x16xf32> to vector<8x16xf32>
    %130 = vector.shape_cast %127 : vector<8x16xf32> to vector<1x8x16xf32>
    tpu.vector_store %arg5[%c0_121, %c0_122, %c192_123], %130 {strides = array<i32>} : memref<1x8x256xf32, #tpu.memory_space<vmem>>, vector<1x8x16xf32>,
    %131 = vector.extract_strided_slice %78 {offsets = [0, 234], sizes = [8, 16], strides = [1, 1]} : vector<8x288xf32> to vector<8x16xf32>
    %c0_124 = arith.constant 0 : index
    %c0_125 = arith.constant 0 : index
    %c208_126 = arith.constant 208 : index
    %132 = vector.load %arg5[%c0_124, %c0_125, %c208_126] : memref<1x8x256xf32, #tpu.memory_space<vmem>>, vector<1x8x16xf32>
    %133 = vector.shape_cast %132 : vector<1x8x16xf32> to vector<8x16xf32>
    %134 = vector.shape_cast %131 : vector<8x16xf32> to vector<1x8x16xf32>
    tpu.vector_store %arg5[%c0_124, %c0_125, %c208_126], %134 {strides = array<i32>} : memref<1x8x256xf32, #tpu.memory_space<vmem>>, vector<1x8x16xf32>,
    %135 = vector.extract_strided_slice %78 {offsets = [0, 252], sizes = [8, 16], strides = [1, 1]} : vector<8x288xf32> to vector<8x16xf32>
    %c0_127 = arith.constant 0 : index
    %c0_128 = arith.constant 0 : index
    %c224_129 = arith.constant 224 : index
    %136 = vector.load %arg5[%c0_127, %c0_128, %c224_129] : memref<1x8x256xf32, #tpu.memory_space<vmem>>, vector<1x8x16xf32>
    %137 = vector.shape_cast %136 : vector<1x8x16xf32> to vector<8x16xf32>
    %138 = vector.shape_cast %135 : vector<8x16xf32> to vector<1x8x16xf32>
    tpu.vector_store %arg5[%c0_127, %c0_128, %c224_129], %138 {strides = array<i32>} : memref<1x8x256xf32, #tpu.memory_space<vmem>>, vector<1x8x16xf32>,
    %139 = vector.extract_strided_slice %78 {offsets = [0, 270], sizes = [8, 16], strides = [1, 1]} : vector<8x288xf32> to vector<8x16xf32>
    %c0_130 = arith.constant 0 : index
    %c0_131 = arith.constant 0 : index
    %c240_132 = arith.constant 240 : index
    %140 = vector.load %arg5[%c0_130, %c0_131, %c240_132] : memref<1x8x256xf32, #tpu.memory_space<vmem>>, vector<1x8x16xf32>
    %141 = vector.shape_cast %140 : vector<1x8x16xf32> to vector<8x16xf32>
    %142 = vector.shape_cast %139 : vector<8x16xf32> to vector<1x8x16xf32>
    tpu.vector_store %arg5[%c0_130, %c0_131, %c240_132], %142 {strides = array<i32>} : memref<1x8x256xf32, #tpu.memory_space<vmem>>, vector<1x8x16xf32>,
    return
  }
  func.func @transform_0(%arg0: i32) -> (i32, i32, i32) {
    %c0_i32 = arith.constant 0 : i32
    %c0_i32_0 = arith.constant 0 : i32
    %c0_i32_1 = arith.constant 0 : i32
    return %arg0, %c0_i32, %c0_i32_0 : i32, i32, i32
  }
  func.func @transform_1(%arg0: i32) -> (i32, i32) {
    %c0_i32 = arith.constant 0 : i32
    %c0_i32_0 = arith.constant 0 : i32
    %c0_i32_1 = arith.constant 0 : i32
    return %c0_i32, %c0_i32_0 : i32, i32
  }
  func.func @transform_2(%arg0: i32) -> (i32, i32) {
    %c0_i32 = arith.constant 0 : i32
    %c0_i32_0 = arith.constant 0 : i32
    %c0_i32_1 = arith.constant 0 : i32
    return %c0_i32, %c0_i32_0 : i32, i32
  }
  func.func @transform_3(%arg0: i32) -> (i32, i32) {
    %c0_i32 = arith.constant 0 : i32
    %c0_i32_0 = arith.constant 0 : i32
    %c0_i32_1 = arith.constant 0 : i32
    return %c0_i32, %c0_i32_0 : i32, i32
  }
  func.func @transform_4(%arg0: i32) -> (i32, i32, i32) {
    %c0_i32 = arith.constant 0 : i32
    %c0_i32_0 = arith.constant 0 : i32
    %c0_i32_1 = arith.constant 0 : i32
    return %arg0, %c0_i32, %c0_i32_0 : i32, i32, i32
  }
}

</mosaic_0001>

<bundles_post_ra>
// kernel: tpu_custom_call.1
= control target key start
LH: loop header
LB: loop body
LE: loop exit
PB: predicated region body
PF: predicated region fallthrough
CT: control target
= control target key end

     0   :  { %9 = vsyncpa [#allocation5], 0  ;;  %s1377_s0 = inlined_call_operand.vmem [shape: bf16[2,4,256], index: 0, kind: input, shape index: {}]   ;;  %s1378_s1 = inlined_call_operand.vmem [shape: bf16[8,36], index: 1, kind: input, shape index: {}]   ;;  %s1379_s2 = inlined_call_operand.vmem [shape: f32[8,1], index: 2, kind: input, shape index: {}]   ;;  %s1380_s3 = inlined_call_operand.vmem [shape: f32[8,1], index: 3, kind: input, shape index: {}]   ;;  %s1381_s4 = inlined_call_operand.hbm [shape: f32[2,8,256], index: 4, kind: output, shape index: {}]  }
   0x1   :  { %11 = vsyncpa [#allocation5 + $0x1], 0  ;;  %s1177_s15 = smov 0   ;;  %s1179_s16 = smov 0  }
   0x2   :  { %s1181_s17 = smov 0   ;;  %s1183_s18 = smov 0  }
   0x3 LB: > { %s1198_s19 = sadd.s32 4294967295, %s1109_s18   ;;  %s905_s20 = sadd.s32 4294967294, %s1109_s18   ;;  %s1109_s18 = sphi %s1183_s18, %s1387_s18   ;;  %s1105_s17 = sphi %s1181_s17, %s1386_s17   ;;  %s1101_s16 = sphi %s1179_s16, %s1385_s16   ;;  %s1097_s15 = sphi %s1177_s15, %s1384_s15  }
   0x4   : > { %s1202_s21 = sadd.s32 1, %s1109_s18   ;;  %s113_s22 = sadd.s32 1, %s1105_s17 }
   0x5   : > { %s110_s23 = ssub.s32 %s1109_s18, %s1202_s21  ;;  %p123_p0 = scmp.ne.s32.totalorder %s1105_s17, %s1101_s16 }
   0x6   : > { %p111_p1 = scmp.eq.s32.totalorder %s110_s23, 0  ;;  %p124_p2 = scmp.eq.s32.totalorder %s1198_s19, 1 }
   0x7   : > { %p129_p3 = scmp.ne.s32.totalorder %s1101_s16, %s1097_s15  ;;  %p130_p4 = scmp.eq.s32.totalorder %s905_s20, 1 }
   0x8   : > { %s1213_s24 = scalar_select %p111_p1, %s1105_s17, %s113_s22  }
   0x9   : > { %p1215_p5 = por %p124_p2, %p123_p0  ;;  %p1219_p6 = por %p130_p4, %p129_p3 }
   0xa   : > { %p908_p7 = scmp.ge.s32.totalorder %s1109_s18, 1  ;;  %p165_p8 = scmp.lt.s32.totalorder %s1109_s18, 3 }
   0xc   : > { %p166_p9 = pnand %p908_p7, %p165_p8 }
   0xd   : > { %p191_p10 = scmp.lt.s32.totalorder (!%p166_p9), %s1198_s19, 1  ;;  %v1111_v0 = vmov (!%p166_p9), 0   ;;  %s1112_s6 = smov (!%p166_p9), 23   ;;  %vm203_vm0 = vcmask (!%p166_p9), 279704   ;;  %vm210_vm1 = vcmask (!%p166_p9), 427304   ;;  %vm217_vm2 = vcmask (!%p166_p9), 574904  }
   0xe   : > { %169 = sbr.rel (%p166_p9) target bundleno = 719 (0x2cf), region = 36  ;;  %197 = vst [vmem:[#allocation2] sm:$0x3f] (!%p166_p9), %v1111_v0  ;;  %681 = vmatprep.mubr.bf16.mxu0 (!%p166_p9), %v1111_v0  ;;  %1025 = vset.pattern.permute.xlu0 (!%p166_p9), %v1111_v0  ;;  %s1113_s7 = smov (!%p166_p9), 19   ;;  %vm224_vm3 = vcmask (!%p166_p9), 722504   ;;  %vm231_vm4 = vcmask (!%p166_p9), 870104   ;;  %v333_v37 = vlaneseq (!%p166_p9) }
   0xf   : > { %1026 = vset.pattern.permute.xlu1 (!%p166_p9), %v1111_v0  ;;  %s1114_s8 = smov (!%p166_p9), 25   ;;  %s1115_s9 = smov (!%p166_p9), 21   ;;  %vm248_vm5 = vcmask (!%p166_p9), 1042424   ;;  %vm249_vm6 = vcmask (!%p166_p9), 117762   ;;  %vm245_vm7 = vcmask (!%p166_p9), 252928   ;;  %vm238_vm8 = vcmask (!%p166_p9), 1017704  }
  0x10   : > { %s1116_s10 = smov (!%p166_p9), 27   ;;  %s1117_s11 = smov (!%p166_p9), 31   ;;  %vm250_vm9 = vmor (!%p166_p9), %vm249_vm6, %vm248_vm5  ;;  %vm257_vm10 = vcmask (!%p166_p9), 263304   ;;  %vm264_vm11 = vcmask (!%p166_p9), 410904   ;;  %vm271_vm12 = vcmask (!%p166_p9), 558504   ;;  %vm278_vm13 = vcmask (!%p166_p9), 706104  }
  0x11   : > { %s1118_s12 = smov (!%p166_p9), 33   ;;  %s1119_s13 = smov (!%p166_p9), 29   ;;  %vm302_vm14 = vcmask (!%p166_p9), 1042408   ;;  %vm303_vm15 = vcmask (!%p166_p9), 101378   ;;  %v1128_v35 = vmov (!%p166_p9), 1983009808  }
  0x12   : > { %s1120_s14 = smov (!%p166_p9), 37   ;;  %s1121_s20 = smov (!%p166_p9), 35   ;;  %v331_v36 = vunpack.c.l.s4 (!%p166_p9), %v1128_v35  ;;  %vm318_vm5 = vcmask (!%p166_p9), 394504   ;;  %v334_v41 = vshrl.u32 (!%p166_p9), %v333_v37, 7  ;;  %vm340_vm6 = vcmask (!%p166_p9), 254976  }
  0x13   : > { %s1122_s22 = smov (!%p166_p9), 45   ;;  %s1123_s23 = smov (!%p166_p9), 39  }
  0x14   : > { %s1126_s29 = smov (!%p166_p9), 47   ;;  %s1127_s30 = smov (!%p166_p9), 49   ;;  %v332_v40 = vunpack.c.0.s8 (!%p166_p9), %v331_v36 }
  0x15   : > { %s192_s27 = scalar_select %p191_p10, %s1198_s19, 1 }
  0x16   : > { %v1248_v42 = vsub.s32 %v332_v40, %v334_v41 }
  0x17   : > { %s930_s28 = sshll.u32 %s192_s27, 2  ;;  %s1124_s27 = smov 41  }
  0x18   : > { %s1230_s5 = scalar_lea.vmem %s1377_s0, %s930_s28  ;;  %s1125_s28 = smov 43  }
  0x19   : > { %v212_v1 = vld [vmem:[%s1230_s5] sm:$0x3]  ;;  %v266_v9 = vld [vmem:[%s1230_s5 + $0x2] sm:$0x3] }
  0x1a   : > { %v198_v2 = vld [vmem:[%s1230_s5] sm:$0x3]  ;;  %214 = vrot.lane.b32.xlu1 %v212_v1, %s1112_s6  ;;  %v259_v10 = vld [vmem:[%s1230_s5 + $0x2] sm:$0x3]  ;;  %s1130_s6 = smov 127  }
  0x1b   : > { %200 = vrot.lane.b32.xlu0 %v198_v2, %s1113_s7  ;;  %v219_v3 = vld [vmem:[%s1230_s5] sm:$0x3]  ;;  %v294_v11 = vld [vmem:[%s1230_s5 + $0x2] sm:$0x3]  ;;  %s1131_s7 = smov 109  }
  0x1c   : > { %v205_v4 = vld [vmem:[%s1230_s5] sm:$0x3]  ;;  %v273_v12 = vld [vmem:[%s1230_s5 + $0x2] sm:$0x3] }
  0x1d   : > { %v226_v5 = vld [vmem:[%s1230_s5] sm:$0x3]  ;;  %v280_v13 = vld [vmem:[%s1230_s5 + $0x2] sm:$0x3] }
  0x1e   : > { %221 = vrot.lane.b32.xlu1 %v219_v3, %s1114_s8  ;;  %v240_v6 = vld [vmem:[%s1230_s5] sm:$0x3]  ;;  %v287_v14 = vld [vmem:[%s1230_s5 + $0x2] sm:$0x3]  ;;  %s1132_s8 = smov 110  }
  0x1f   : > { %207 = vrot.lane.b32.xlu0 %v205_v4, %s1115_s9  ;;  %v252_v7 = vld [vmem:[%s1230_s5] sm:$0x3]  ;;  %v306_v15 = vld [vmem:[%s1230_s5 + $0x2] sm:$0x3]  ;;  %s1133_s9 = smov 92   ;;  %v1136_v4 = vmov 0.0  }
  0x20   : > { %v233_v8 = vld [vmem:[%s1230_s5] sm:$0x3]  ;;  %v313_v16 = vld [vmem:[%s1230_s5 + $0x2] sm:$0x3]  ;;  %s1129_s5 = smov 126   ;;  %936 = vmatprep.subr.bf16.mxu1 %v1136_v4 }
  0x22   : > { %228 = vrot.lane.b32.xlu1 %v226_v5, %s1116_s10  ;;  %s1134_s10 = smov 108  }
  0x23   : > { %242 = vrot.lane.b32.xlu0 %v240_v6, %s1117_s11  ;;  %s1135_s11 = smov 91  }
  0x26   : > { %254 = vrot.lane.b32.xlu1 %v252_v7, %s1118_s12  ;;  %s1138_s12 = smov 90  }
  0x27   : > { %235 = vrot.lane.b32.xlu0 %v233_v8, %s1119_s13  ;;  %s1144_s13 = smov 120  }
  0x2a   : > { %268 = vrot.lane.b32.xlu1 %v266_v9, %s1120_s14  ;;  %s1146_s14 = smov 106  }
  0x2b   : > { %261 = vrot.lane.b32.xlu0 %v259_v10, %s1121_s20  ;;  %s1147_s20 = smov 116  }
  0x2e   : > { %296 = vrot.lane.b32.xlu1 %v294_v11, %s1122_s22  ;;  %s1148_s22 = smov 104  }
  0x2f   : > { %275 = vrot.lane.b32.xlu0 %v273_v12, %s1123_s23  ;;  %s1149_s23 = smov 102  }
  0x32   : > { %289 = vrot.lane.b32.xlu1 %v287_v14, %s1125_s28  ;;  %s188_s28 = sand.u32 1, %s1101_s16  }
  0x33   : > { %282 = vrot.lane.b32.xlu0 %v280_v13, %s1124_s27 }
  0x36   : > { %315 = vrot.lane.b32.xlu1 %v313_v16, %s1127_s30  ;;  %v739_v16 = vld [vmem:[%s1380_s3] sm:$0xff]  ;;  %s1139_s30 = smov 100  }
  0x37   : > { %308 = vrot.lane.b32.xlu0 %v306_v15, %s1126_s29  ;;  %v730_v15 = vld [vmem:[%s1379_s2] sm:$0xff]  ;;  %s909_s29 = sshll.u32 %s188_s28, 4 }
  0x8c   : > { %v215_v17 = vpop.permute.xlu1 %214 }
  0x8d   : > { %v201_v18 = vpop.permute.xlu0 %200 }
  0x8e   : > { %204 = vst.msk [vmem:[#allocation2] sm:$0x3] %vm203_vm0, %v201_v18  ;;  %vm285_vm0 = vcmask 853704  }
  0x90   : > { %v222_v19 = vpop.permute.xlu1 %221 }
  0x91   : > { %v208_v20 = vpop.permute.xlu0 %207 }
  0x92   : > { %211 = vst.msk [vmem:[#allocation2] sm:$0x3] %vm210_vm1, %v208_v20  ;;  %vm299_vm1 = vcmask 367616  }
  0x93   : > { %218 = vst.msk [vmem:[#allocation2] sm:$0x3] %vm217_vm2, %v215_v17  ;;  %vm292_vm2 = vcmask 1001304  }
  0x94   : > { %225 = vst.msk [vmem:[#allocation2] sm:$0x3] %vm224_vm3, %v222_v19  ;;  %v229_v21 = vpop.permute.xlu1 %228  ;;  %vm304_vm3 = vmor %vm303_vm15, %vm302_vm14  ;;  %vm488_vm14 = vcmask 883712   ;;  %vm518_vm15 = vcmask 752640  }
  0x95   : > { %v243_v22 = vpop.permute.xlu0 %242  ;;  %232 = vst.msk [vmem:[#allocation2] sm:$0x3] %vm231_vm4, %v229_v21  ;;  %vm311_vm4 = vcmask 246904  }
  0x96   : > { %v244_v23 = vrot.slane %v243_v22, 6 }
  0x98   : > { %v255_v24 = vpop.permute.xlu1 %254  ;;  %v246_v26 = vsel %vm245_vm7, %v244_v23, %v243_v22  ;;  %vm1137_vm7 = vmmov 0  }
  0x99   : > { %v236_v25 = vpop.permute.xlu0 %235  ;;  %942 = vmatprep.mubr.msk.bf16.mxu1 %vm1137_vm7, %v1136_v4  ;;  %vm767_vm7 = vcmask 523648  }
  0x9a   : > { %239 = vst.msk [vmem:[#allocation2] sm:$0x3] %vm238_vm8, %v236_v25  ;;  %vm372_vm8 = vcmask 257026  }
  0x9b   : > { %251 = vst.msk [vmem:[#allocation2] sm:$0xf] %vm250_vm9, %v246_v26  ;;  %vm365_vm9 = vcmask 1043456  }
  0x9c   : > { %258 = vst.msk [vmem:[#allocation2 + $0x2] sm:$0x3] %vm257_vm10, %v255_v24  ;;  %v269_v27 = vpop.permute.xlu1 %268  ;;  %vm367_vm10 = vcmask 1039360  }
  0x9d   : > { %v262_v28 = vpop.permute.xlu0 %261 }
  0x9e   : > { %265 = vst.msk [vmem:[#allocation2 + $0x2] sm:$0x3] %vm264_vm11, %v262_v28  ;;  %vm398_vm11 = vcmask 1031168  }
  0x9f   : > { %272 = vst.msk [vmem:[#allocation2 + $0x2] sm:$0x3] %vm271_vm12, %v269_v27  ;;  %vm428_vm12 = vcmask 900096  }
  0xa0   : > { %v297_v29 = vpop.permute.xlu1 %296 }
  0xa1   : > { %v276_v30 = vpop.permute.xlu0 %275  ;;  %v298_v31 = vrot.slane %v297_v29, 6 }
  0xa2   : > { %279 = vst.msk [vmem:[#allocation2 + $0x2] sm:$0x3] %vm278_vm13, %v276_v30  ;;  %vm458_vm13 = vcmask 891904  }
  0xa3   : > { %v300_v34 = vsel %vm299_vm1, %v298_v31, %v297_v29  ;;  %vm578_vm1 = vcmask 736256  }
  0xa4   : > { %v290_v33 = vpop.permute.xlu1 %289 }
  0xa5   : > { %v283_v32 = vpop.permute.xlu0 %282 }
  0xa6   : > { %286 = vst.msk [vmem:[#allocation2 + $0x2] sm:$0x3] %vm285_vm0, %v283_v32  ;;  %vm548_vm0 = vcmask 744448  }
  0xa7   : > { %293 = vst.msk [vmem:[#allocation2 + $0x2] sm:$0x3] %vm292_vm2, %v290_v33  ;;  %vm639_vm2 = vcmask 1041408  }
  0xa8   : > { %305 = vst.msk [vmem:[#allocation2 + $0x2] sm:$0xf] %vm304_vm3, %v300_v34  ;;  %v316_v39 = vpop.permute.xlu1 %315  ;;  %vm635_vm3 = vcmask 293888  }
  0xa9   : > { %v309_v38 = vpop.permute.xlu0 %308 }
  0xaa   : > { %312 = vst.msk [vmem:[#allocation2 + $0x4] sm:$0x3] %vm311_vm4, %v309_v38  ;;  %vm751_vm4 = vcmask 130048  }
  0xab   : > { %319 = vst.msk [vmem:[#allocation2 + $0x4] sm:$0x3] %vm318_vm5, %v316_v39  ;;  %vm757_vm5 = vcmask 261248  }
  0xb2   : > { %v374_v43 = vld [vmem:[#allocation2] sm:$0x3f] }
  0xb3   : > { %v342_v44 = vld [vmem:[#allocation2] sm:$0x3f]  ;;  %v383_v45 = vrot.slane %v374_v43, %v1248_v42  ;;  %v376_v62 = vcombine.high %v374_v43, %v374_v43 }
  0xb4   : > { %v358_v46 = vrot.slane %v342_v44, %v1248_v42  ;;  %v434_v47 = vld [vmem:[#allocation2] sm:$0x3f]  ;;  %v344_v57 = vcombine.low %v342_v44, %v342_v44 }
  0xb5   : > { %v404_v48 = vld [vmem:[#allocation2] sm:$0x3f]  ;;  %391 = vrot.lane.b32.xlu0 %v383_v45, %s1129_s5  ;;  %v443_v50 = vrot.slane %v434_v47, %v1248_v42  ;;  %v390_v0 = vrot.slane %v376_v62, %v1248_v42  ;;  %v436_v2 = vcombine.high %v434_v47, %v434_v47 }
  0xb6   : > { %v320_v49 = vld [vmem:[#allocation2] sm:$0x3f]  ;;  %361 = vrot.lane.b32.xlu1 %v358_v46, %s1130_s6  ;;  %v420_v51 = vrot.slane %v404_v48, %v1248_v42  ;;  %v351_v61 = vrot.slane %v344_v57, %v1248_v42  ;;  %v406_v63 = vcombine.low %v404_v48, %v404_v48 }
  0xb7   : > { %912 = vst.sshfl [vmem:[#allocation3] sm:$0xf pattern:$0x76325410] %v320_v49  ;;  %v494_v52 = vld [vmem:[#allocation2] sm:$0x3f]  ;;  %v322_v54 = vcombine.high %v320_v49, %v320_v49  ;;  %v450_v5 = vrot.slane %v436_v2, %v1248_v42 }
  0xb8   : > { %v464_v53 = vld [vmem:[#allocation2] sm:$0x3f]  ;;  %v503_v55 = vrot.slane %v494_v52, %v1248_v42  ;;  %v413_v1 = vrot.slane %v406_v63, %v1248_v42  ;;  %v496_v7 = vcombine.high %v494_v52, %v494_v52 }
  0xb9   : > { %451 = vrot.lane.b32.xlu0 %v443_v50, %s1131_s7  ;;  %v480_v56 = vrot.slane %v464_v53, %v1248_v42  ;;  %v336_v58 = vrot.slane %v322_v54, %v1248_v42  ;;  %v524_v59 = vld [vmem:[#allocation2] sm:$0x3f]  ;;  %v466_v3 = vcombine.low %v464_v53, %v464_v53 }
  0xba   : > { %423 = vrot.lane.b32.xlu1 %v420_v51, %s1132_s8  ;;  %v540_v60 = vrot.slane %v524_v59, %v1248_v42  ;;  %v526_v8 = vcombine.low %v524_v59, %v524_v59  ;;  %v554_v9 = vld [vmem:[#allocation2] sm:$0x3f]  ;;  %v510_v10 = vrot.slane %v496_v7, %v1248_v42 }
  0xbb   : > { %341 = vst.msk [vmem:[#allocation3 + $0x8] sm:$0x3] %vm340_vm6, %v336_v58  ;;  %v473_v6 = vrot.slane %v466_v3, %v1248_v42  ;;  %v556_v12 = vcombine.high %v554_v9, %v554_v9  ;;  %v563_v14 = vrot.slane %v554_v9, %v1248_v42 }
  0xbc   : > { %v533_v11 = vrot.slane %v526_v8, %v1248_v42 }
  0xbd   : > { %511 = vrot.lane.b32.xlu0 %v503_v55, %s1133_s9  ;;  %v570_v13 = vrot.slane %v556_v12, %v1248_v42 }
  0xbe   : > { %483 = vrot.lane.b32.xlu1 %v480_v56, %s1134_s10 }
  0xc1   : > { %359 = vrot.lane.b32.xlu0 %v351_v61, %s1130_s6  ;;  %s1140_s6 = smov 114  }
  0xc2   : > { %543 = vrot.lane.b32.xlu1 %v540_v60, %s1135_s11 }
  0xc5   : > { %421 = vrot.lane.b32.xlu0 %v413_v1, %s1132_s8 }
  0xc6   : > { %393 = vrot.lane.b32.xlu1 %v390_v0, %s1129_s5 }
  0xc9   : > { %481 = vrot.lane.b32.xlu0 %v473_v6, %s1134_s10 }
  0xca   : > { %453 = vrot.lane.b32.xlu1 %v450_v5, %s1131_s7  ;;  %s1306_s7 = scalar_lea.vmem [#allocation4], %s909_s29 }
  0xcb   : > { %s846_s27 = sshll.u32 %s1306_s7, 4  ;;  %s1333_s27 = int_to_ptr.vmem [resolvable:$true] %s846_s27 }
  0xcd   : > { %541 = vrot.lane.b32.xlu0 %v533_v11, %s1135_s11  ;;  %v584_v11 = vld [vmem:[%s1378_s1] sm:$0xf]  ;;  %s1142_s11 = smov 112  }
  0xce   : > { %513 = vrot.lane.b32.xlu1 %v510_v10, %s1133_s9  ;;  %s1141_s9 = smov 124  }
  0xd1   : > { %571 = vrot.lane.b32.xlu0 %v563_v14, %s1138_s12 }
  0xd2   : > { %573 = vrot.lane.b32.xlu1 %v570_v13, %s1138_s12  ;;  %s1143_s12 = smov 122  }
  0xd5   : > { %733 = vperm.xlu0 %1025, %v730_v15  }
  0xd6   : > { %742 = vperm.xlu1 %1026, %v739_v16  }
 0x127   : > { %v392_v17 = vpop.permute.xlu0 %391 }
 0x128   : > { %v362_v18 = vpop.permute.xlu1 %361  ;;  %v395_v31 = vrot.slane %v392_v17, 4 }
 0x129   : > { %373 = vst.msk [vmem:[#allocation3 + $0x8] sm:$0xc] %vm372_vm8, %v362_v18  ;;  %v364_v25 = vrot.slane %v362_v18, 4 }
 0x12b   : > { %v452_v19 = vpop.permute.xlu0 %451 }
 0x12c   : > { %v424_v20 = vpop.permute.xlu1 %423  ;;  %v455_v41 = vrot.slane %v452_v19, 4 }
 0x12d   : > { %433 = vst.msk [vmem:[#allocation3 + $0x14] sm:$0xc] %vm372_vm8, %v424_v20  ;;  %v426_v32 = vrot.slane %v424_v20, 4 }
 0x12f   : > { %v512_v21 = vpop.permute.xlu0 %511 }
 0x130   : > { %v484_v22 = vpop.permute.xlu1 %483  ;;  %v515_v52 = vrot.slane %v512_v21, 4 }
 0x131   : > { %493 = vst.msk [vmem:[#allocation3 + $0x20] sm:$0xc] %vm372_vm8, %v484_v22  ;;  %v486_v42 = vrot.slane %v484_v22, 4 }
 0x133   : > { %v360_v24 = vpop.permute.xlu0 %359 }
 0x134   : > { %v544_v23 = vpop.permute.xlu1 %543  ;;  %v363_v26 = vrot.slane %v360_v24, 4 }
 0x135   : > { %553 = vst.msk [vmem:[#allocation3 + $0x2c] sm:$0xc] %vm372_vm8, %v544_v23  ;;  %v546_v53 = vrot.slane %v544_v23, 4  ;;  %vm772_vm8 = vcmask 654848  }
 0x136   : > { %v366_v27 = vsel %vm365_vm9, %v363_v26, %v364_v25 }
 0x137   : > { %v368_v28 = vsel %vm367_vm10, %v360_v24, %v366_v27  ;;  %v422_v30 = vpop.permute.xlu0 %421  ;;  %vm782_vm10 = vcmask 917248  }
 0x138   : > { %v394_v29 = vpop.permute.xlu1 %393  ;;  %371 = vst [vmem:[#allocation3] sm:$0xcc] %v368_v28  ;;  %v425_v34 = vrot.slane %v422_v30, 4 }
 0x139   : > { %v396_v33 = vrot.slane %v394_v29, 4  ;;  %403 = vst.msk [vmem:[#allocation3 + $0x14] sm:$0x3] %vm340_vm6, %v394_v29 }
 0x13a   : > { %v427_v36 = vsel %vm365_vm9, %v425_v34, %v426_v32 }
 0x13b   : > { %v397_v35 = vsel %vm365_vm9, %v395_v31, %v396_v33  ;;  %v429_v38 = vsel %vm428_vm12, %v422_v30, %v427_v36  ;;  %v482_v40 = vpop.permute.xlu0 %481  ;;  %vm789_vm12 = vcmask 932864  }
 0x13c   : > { %v399_v37 = vsel %vm398_vm11, %v392_v17, %v397_v35  ;;  %v454_v39 = vpop.permute.xlu1 %453  ;;  %432 = vst [vmem:[#allocation3 + $0xc] sm:$0xcc] %v429_v38  ;;  %v485_v44 = vrot.slane %v482_v40, 4  ;;  %vm823_vm11 = vcmask 818176  }
 0x13d   : > { %402 = vst [vmem:[#allocation3 + $0xc] sm:$0x33] %v399_v37  ;;  %v456_v43 = vrot.slane %v454_v39, 4  ;;  %463 = vst.msk [vmem:[#allocation3 + $0x20] sm:$0x3] %vm340_vm6, %v454_v39 }
 0x13e   : > { %v487_v46 = vsel %vm365_vm9, %v485_v44, %v486_v42 }
 0x13f   : > { %v457_v45 = vsel %vm365_vm9, %v455_v41, %v456_v43  ;;  %v489_v48 = vsel %vm488_vm14, %v482_v40, %v487_v46  ;;  %v542_v50 = vpop.permute.xlu0 %541 }
 0x140   : > { %v459_v47 = vsel %vm458_vm13, %v452_v19, %v457_v45  ;;  %v514_v49 = vpop.permute.xlu1 %513  ;;  %v1036_v51 = vld [vmem:[#allocation3 + $0x8] ss:$12 sps:$4 sm:$0xff]   ;;  %492 = vst [vmem:[#allocation3 + $0x18] sm:$0xcc] %v489_v48  ;;  %v545_v55 = vrot.slane %v542_v50, 4  ;;  %vm792_vm13 = vcmask 1048448  }
 0x141   : > { %462 = vst [vmem:[#allocation3 + $0x18] sm:$0x33] %v459_v47  ;;  %v516_v54 = vrot.slane %v514_v49, 4  ;;  %523 = vst.msk [vmem:[#allocation3 + $0x2c] sm:$0x3] %vm340_vm6, %v514_v49  ;;  %937 = vmatpush3.bf16.msra.mxu1 %v1036_v51 }
 0x142   : > { %v547_v57 = vsel %vm365_vm9, %v545_v55, %v546_v53  ;;  %938 = vmatprep.subr.bf16.mxu1 %v1136_v4 }
 0x143   : > { %v517_v56 = vsel %vm365_vm9, %v515_v52, %v516_v54  ;;  %v549_v59 = vsel %vm548_vm0, %v542_v50, %v547_v57  ;;  %v572_v61 = vpop.permute.xlu0 %571 }
 0x144   : > { %v519_v58 = vsel %vm518_vm15, %v512_v21, %v517_v56  ;;  %v574_v60 = vpop.permute.xlu1 %573  ;;  %v1037_v62 = vld [vmem:[#allocation3 + $0x4] ss:$12 sps:$4 sm:$0xff]   ;;  %v1039_v63 = vld [vmem:[#allocation3] ss:$12 sps:$4 sm:$0xff]   ;;  %552 = vst [vmem:[#allocation3 + $0x24] sm:$0xcc] %v549_v59 }
 0x145   : > { %522 = vst [vmem:[#allocation3 + $0x24] sm:$0x33] %v519_v58  ;;  %v576_v0 = vrot.slane %v574_v60, 4  ;;  %583 = vst.msk [vmem:[#allocation3 + $0x38] sm:$0x3] %vm340_vm6, %v574_v60  ;;  %v575_v1 = vrot.slane %v572_v61, 4  ;;  %649 = vmatprep.subr.bf16.mxu0 %v1037_v62 }
 0x146   : > { %650 = vmatpush1.bf16.msra.mxu0 %v1039_v63  ;;  %vm762_vm6 = vcmask 392448  }
 0x147   : > { %v577_v2 = vsel %vm365_vm9, %v575_v1, %v576_v0  ;;  %vm777_vm9 = vcmask 786048  }
 0x148   : > { %v579_v3 = vsel %vm578_vm1, %v572_v61, %v577_v2  ;;  %v1040_v5 = vld [vmem:[#allocation3 + $0x20] ss:$12 sps:$4 sm:$0xff]  }
 0x149   : > { %582 = vst [vmem:[#allocation3 + $0x30] sm:$0x33] %v579_v3  ;;  %939 = vmatpush3.bf16.msra.mxu1 %v1040_v5 }
 0x14a   : > { %940 = vmatprep.subr.bf16.mxu1 %v1136_v4 }
 0x14c   : > { %v1041_v6 = vld [vmem:[#allocation3 + $0x1c] ss:$12 sps:$4 sm:$0xff]   ;;  %v1043_v7 = vld [vmem:[#allocation3 + $0x18] ss:$12 sps:$4 sm:$0xff]  }
 0x14d   : > { %v1044_v8 = vld [vmem:[#allocation3 + $0x38] ss:$0 sps:$4 sm:$0x33]   ;;  %651 = vmatprep.subr.bf16.mxu0 %v1041_v6 }
 0x14e   : > { %652 = vmatpush1.bf16.msra.mxu0 %v1043_v7  ;;  %v647_v9 = vsel %vm639_vm2, %v1044_v8, 0 }
 0x14f   : > { %941 = vmatpush3.bf16.msra.mxu1 %v647_v9 }
 0x150   : > { %v593_v10 = vld [vmem:[#allocation3 + $0x30] sm:$0x33] }
 0x151   : > { %v920_v12 = vcombine.high %v593_v10, %v593_v10  ;;  %v919_v13 = vcombine.low %v593_v10, %v593_v10 }
 0x152   : > { %943 = vmatmul.mubr.msk.bf16.vlgmr.msra.gmra.mrb[0].mxu1 %vm635_vm3, %v584_v11 }
 0x153   : > { %922 = vmatprep.subr.msk.bf16.mxu0 %vm639_vm2, %v920_v12  ;;  %v641_v4 = vsel %vm639_vm2, %v919_v13, 0 }
 0x154   : > { %654 = vmatpush1.bf16.msra.mxu0 %v641_v4  ;;  %v734_v14 = vpop.permute.xlu0 %733 }
 0x155   : > { %v743_v16 = vpop.permute.xlu1 %742 }
 0x157   : > { %923 = vmatmul.mubr.msk.bf16.vlgmr.msra.gmra.mrb[0].mxu0 %vm635_vm3, %v584_v11 }
 0x225   : > { %v724_v15 = vpop.f32.mrb[0].mxu1 }
 0x226   : > { %v738_v17 = vmul.f32 %v734_v14, %v724_v15  ;;  %v944_v18 = vpop.f32.mrb[1].mxu1 }
 0x227   : > { %v727_v19 = vpop.f32.mrb[2].mxu1 }
 0x228   : > { %v747_v20 = vadd.f32 %v743_v16, %v738_v17  ;;  %v945_v21 = vpop.f32.mrb[3].mxu1 }
 0x22a   : > { %v683_v22 = vpop.f32.mrb[0].mxu0  ;;  %v750_v25 = vmax.f32 %v747_v20, 0.0 }
 0x22b   : > { %v736_v23 = vmul.f32 %v734_v14, %v683_v22  ;;  %v685_v24 = vpop.f32.mrb[1].mxu0 }
 0x22c   : > { %v737_v26 = vmul.f32 %v734_v14, %v685_v24  ;;  %v687_v27 = vpop.f32.mrb[2].mxu0  ;;  %821 = vrot.lane.b32.xlu1 %v750_v25, %s1139_s30 }
 0x22d   : > { %v745_v28 = vadd.f32 %v743_v16, %v736_v23  ;;  %v688_v29 = vpop.f32.mrb[3].mxu0 }
 0x22e   : > { %v746_v31 = vadd.f32 %v743_v16, %v737_v26 }
 0x22f   : > { %v748_v30 = vmax.f32 %v745_v28, 0.0 }
 0x230   : > { %v749_v32 = vmax.f32 %v746_v31, 0.0 }
 0x231   : > { %754 = vrot.lane.b32.xlu0 %v748_v30, %s1129_s5  ;;  %785 = vrot.lane.b32.xlu1 %v748_v30, %s1140_s6  ;;  %752 = vst.msk [vmem:[%s1306_s7] sm:$0xff] %vm751_vm4, %v748_v30  ;;  %s1145_s5 = smov 118  }
 0x235   : > { %759 = vrot.lane.b32.xlu0 %v748_v30, %s1141_s9  ;;  %794 = vrot.lane.b32.xlu1 %v749_v32, %s1142_s11  ;;  %s1047_s9 = scalar_lea.vmem %s1333_s27, 256  ;;  %s1151_s11 = smov [#allocation4]  }
 0x236   : > { %p1048_p11 = scmp.ne.s32.totalorder %s1333_s27, %s1047_s9 }
 0x238   : > { %p1049_p12 = pnand %p1048_p11, %p1215_p5 }
 0x239   : > { %764 = vrot.lane.b32.xlu0 %v748_v30, %s1143_s12  ;;  %798 = vrot.lane.b32.xlu1 %v749_v32, %s1132_s8  ;;  %s1150_s8 = smov 98   ;;  %s1051_s12 = sshll.u32 %s1151_s11, 4  ;;  %s1052_s12 = int_to_ptr.vmem [resolvable:$false] %s1051_s12 }
 0x23a   : > { %p1050_p13 = pneg %p1049_p12  ;;  %p1054_p0 = scmp.lt.s32.totalorder %s1333_s27, %s1052_s12 }
 0x23d   : > { %769 = vrot.lane.b32.xlu0 %v748_v30, %s1144_s13  ;;  %802 = vrot.lane.b32.xlu1 %v749_v32, %s1134_s10  ;;  %s931_s10 = sshll.u32 %s1198_s19, 8  ;;  %s832_s19 = scalar_lea.sflag [#allocation5], %s188_s28 }
 0x23e   : > { %s1053_s13 = scalar_lea.vmem %s1052_s12, 512 }
 0x23f   : > { %p1055_p1 = scmp.lt.s32.totalorder %s1053_s13, %s1047_s9 }
 0x241   : > { %774 = vrot.lane.b32.xlu0 %v748_v30, %s1145_s5  ;;  %806 = vrot.lane.b32.xlu1 %v749_v32, %s1146_s14  ;;  %p1056_p2 = por %p1055_p1, %p1054_p0 }
 0x243   : > { %p1057_p3 = pnand %p1056_p2, %p1050_p13 }
 0x245   : > { %779 = vrot.lane.b32.xlu0 %v748_v30, %s1147_s20  ;;  %810 = vrot.lane.b32.xlu1 %v749_v32, %s1148_s22 }
 0x249   : > { %819 = vrot.lane.b32.xlu0 %v749_v32, %s1139_s30  ;;  %814 = vrot.lane.b32.xlu1 %v749_v32, %s1149_s23 }
 0x24d   : > { %787 = vrot.lane.b32.xlu0 %v749_v32, %s1140_s6  ;;  %827 = vrot.lane.b32.xlu1 %v750_v25, %s1150_s8  ;;  %s1331_s6 = scalar_lea.hbm %s1381_s4, %s931_s10 }
 0x29e   : > { %v822_v33 = vpop.permute.xlu1 %821 }
 0x2a3   : > { %v755_v34 = vpop.permute.xlu0 %754  ;;  %v786_v35 = vpop.permute.xlu1 %785 }
 0x2a4   : > { %758 = vst.msk [vmem:[%s1306_s7] sm:$0xff] %vm757_vm5, %v755_v34 }
 0x2a7   : > { %v760_v36 = vpop.permute.xlu0 %759  ;;  %v795_v37 = vpop.permute.xlu1 %794 }
 0x2a8   : > { %763 = vst.msk [vmem:[%s1306_s7] sm:$0xff] %vm762_vm6, %v760_v36 }
 0x2a9   : > { %797 = vst.msk [vmem:[%s1306_s7 + $0x8] sm:$0xff] %vm751_vm4, %v795_v37 }
 0x2ab   : > { %v765_v38 = vpop.permute.xlu0 %764  ;;  %v799_v39 = vpop.permute.xlu1 %798 }
 0x2ac   : > { %768 = vst.msk [vmem:[%s1306_s7] sm:$0xff] %vm767_vm7, %v765_v38 }
 0x2ad   : > { %801 = vst.msk [vmem:[%s1306_s7 + $0x8] sm:$0xff] %vm757_vm5, %v799_v39 }
 0x2af   : > { %v770_v40 = vpop.permute.xlu0 %769  ;;  %v803_v41 = vpop.permute.xlu1 %802 }
 0x2b0   : > { %773 = vst.msk [vmem:[%s1306_s7] sm:$0xff] %vm772_vm8, %v770_v40 }
 0x2b1   : > { %805 = vst.msk [vmem:[%s1306_s7 + $0x8] sm:$0xff] %vm762_vm6, %v803_v41 }
 0x2b3   : > { %v775_v42 = vpop.permute.xlu0 %774  ;;  %v807_v43 = vpop.permute.xlu1 %806 }
 0x2b4   : > { %778 = vst.msk [vmem:[%s1306_s7] sm:$0xff] %vm777_vm9, %v775_v42 }
 0x2b5   : > { %809 = vst.msk [vmem:[%s1306_s7 + $0x8] sm:$0xff] %vm767_vm7, %v807_v43 }
 0x2b7   : > { %v780_v44 = vpop.permute.xlu0 %779  ;;  %v811_v45 = vpop.permute.xlu1 %810 }
 0x2b8   : > { %783 = vst.msk [vmem:[%s1306_s7] sm:$0xff] %vm782_vm10, %v780_v44 }
 0x2b9   : > { %813 = vst.msk [vmem:[%s1306_s7 + $0x8] sm:$0xff] %vm772_vm8, %v811_v45 }
 0x2bb   : > { %v820_v46 = vpop.permute.xlu0 %819  ;;  %v815_v47 = vpop.permute.xlu1 %814 }
 0x2bc   : > { %v824_v48 = vsel %vm823_vm11, %v820_v46, %v822_v33  ;;  %817 = vst.msk [vmem:[%s1306_s7 + $0x8] sm:$0xff] %vm777_vm9, %v815_v47 }
 0x2bd   : > { %826 = vst.msk [vmem:[%s1306_s7 + $0x8] sm:$0xff] %vm782_vm10, %v824_v48 }
 0x2bf   : > { %v788_v49 = vpop.permute.xlu0 %787  ;;  %v828_v50 = vpop.permute.xlu1 %827 }
 0x2c0   : > { %v790_v51 = vsel %vm789_vm12, %v786_v35, %v788_v49  ;;  %830 = vst.msk [vmem:[%s1306_s7 + $0x8] sm:$0xff] %vm792_vm13, %v828_v50 }
 0x2c1   : > { %793 = vst.msk [vmem:[%s1306_s7] sm:$0xff] %vm792_vm13, %v790_v51 }
 0x2c2   : > { %1060 = shalt.err (!%p1057_p3)
}
 0x2c3   : > { %s1061_s28 = scalar_lea.hbm %s1331_s6, 256  ;;  %s1065_s14 = scalar_lea.hbm %s1381_s4, 512 }
 0x2c4   : > { %p1062_p4 = scmp.ne.s32.totalorder %s1331_s6, %s1061_s28  ;;  %p1066_p9 = scmp.lt.u32.totalorder %s1331_s6, %s1381_s4 }
 0x2c5   : > { %p1067_p10 = scmp.lt.u32.totalorder %s1065_s14, %s1061_s28  ;;  %p1069_p12 = scmp.lt.u32.totalorder %s1061_s28, %s1331_s6 }
 0x2c6   : > { %p1063_p7 = pnand %p1062_p4, %p1215_p5 }
 0x2c7   : > { %p1068_p11 = por %p1067_p10, %p1066_p9 }
 0x2c8   : > { %p1064_p8 = pneg %p1063_p7 }
 0x2c9   : > { %p1070_p13 = por %p1069_p12, %p1068_p11 }
 0x2cb   : > { %p1071_p0 = pnand %p1070_p13, %p1064_p8 }
 0x2cd   : > { %1074 = shalt.err (!%p1071_p0)
}
 0x2ce   : > { %946 = dma.vmem_to_hbm [thread:$0]  (%p1215_p5), %s1333_s27, 256, %s1331_s6, %s832_s19  }
 0x2cf PF: > { %p952_p1 = scmp.ge.s32.totalorder %s1109_s18, 2  ;;  %s858_s23 = sand.u32 1, %s1097_s15  }
 0x2d0   : > { %s859_s8 = scalar_lea.sflag [#allocation5], %s858_s23 }
 0x2d1   : > { %p949_p2 = pnand %p952_p1, %p1219_p6 }
 0x2d3   : > { %1092 = dma.done.wait (!%p949_p2), %s859_s8, 256  }
 0x2d4   : > { %1094 = vsyncadd (!%p949_p2), %s859_s8, 4294967040  ;;  %p14_p3 = scmp.ge.s32.totalorder %s1202_s21, 4   ;;  %s1384_s15 = smov %s1101_s16 }
 0x2d5   : > { %s1385_s16 = smov %s1105_s17  ;;  %s1386_s17 = smov %s1213_s24 }
 0x2d6   : > { %s1387_s18 = smov %s1202_s21  ;;  %16 = sbr.rel (!%p14_p3) target bundleno = 3 (0x3), region = 71 }
 0x2dd   :  { %864 = vsyncpa [#allocation5], 1 }
 0x2de   :  { %866 = vsyncpa [#allocation5 + $0x1], 1 }

</bundles_post_ra>
